<compile_context>
chip_gen: v7x
topology: tpu7x:2x2x1
jax: 0.10.0
libtpu: 0.0.40
codegen_flags: <defaults>
</compile_context>

<pallas_src>
import functools

import jax
import jax.numpy as jnp
from jax.experimental import pallas as pl
from jax.experimental.pallas import tpu as pltpu

DROP_P = 0.2   # F.dropout(x, p=0.2) with default training=True -> applied at forward time
LANE = 128
# drop when (top 24 hash bits) < DROP_P * 2^24, keep otherwise -> P(keep) = 1 - DROP_P
_DROP_THRESH_24 = int(DROP_P * (1 << 24))


def _round_up(n, m):
    return ((n + m - 1) // m) * m


def _has_bf16_vpu():
    """v6e/v7x have a native bf16 VPU; v5e (and older) do not."""
    try:
        kind = jax.devices()[0].device_kind.lower()
    except Exception:
        return False
    return ("v6" in kind) or ("v7" in kind)


def _keep_mask(shape, row_offset_u32, seed_u32):
    """Boolean keep-mask from a splitmix32-style integer hash of (seed, global index).

    Pure jnp ops (portable; pltpu.prng_* has no CPU/interpret lowering) and the
    comparison stays in the integer domain -- no float casts or 1/2^24 scaling.
    Every batch tile automatically gets a distinct mask via row_offset.
    """
    row = jax.lax.broadcasted_iota(jnp.uint32, shape, 0)
    col = jax.lax.broadcasted_iota(jnp.uint32, shape, 1)
    idx = (row + row_offset_u32) * jnp.uint32(shape[1]) + col
    z = idx ^ (seed_u32 * jnp.uint32(0x9E3779B9))
    z = (z ^ (z >> 16)) * jnp.uint32(0x7FEB352D)
    z = (z ^ (z >> 15)) * jnp.uint32(0x846CA68B)
    z = z ^ (z >> 16)
    # top 24 bits -> fits in positive int32, signed compare is safe.
    return (z >> 8).astype(jnp.int32) >= jnp.int32(_DROP_THRESH_24)


def mlp_kernel(seed_ref,                 # int32[1]        (scalar prefetch, SMEM)
               x_ref,                    # [TB, in_dim]    f32 (feature dim NOT lane-padded)
               ws_ref, bs_ref,           # [in_dim, u_p]   bf16, [1, u_p] f32
               w2_ref, b2_ref,           # [u_p, u_p]      bf16, [1, u_p] f32
               w3_ref, b3_ref,           # [u_p, u_p]      bf16 (pre-scaled by 1/(1-p)), [1, u_p] f32
               we_ref, be_ref,           # [u_p, out_p]    bf16, [1, out_p] f32
               o_ref,                    # [TB, out_p]     f32
               *, bf16_ew):
    # Elementwise dtype: bf16 on v6e/v7x (packed [16,128] vregs -> ~half the VALU
    # ops for bias/relu/select), f32 on v5e where bf16 VALU would be emulated.
    ew = jnp.bfloat16 if bf16_ew else jnp.float32

    x = x_ref[...].astype(jnp.bfloat16)

    # fc_s + relu   (K = in_dim, un-padded; the MXU handles small K fine)
    h = jnp.dot(x, ws_ref[...], preferred_element_type=jnp.float32).astype(ew)
    h = jnp.maximum(h + bs_ref[...].astype(ew), 0)

    # fc2 + relu
    h = jnp.dot(h.astype(jnp.bfloat16), w2_ref[...],
                preferred_element_type=jnp.float32).astype(ew)
    h = jnp.maximum(h + b2_ref[...].astype(ew), 0)

    # dropout(p=0.2): pure keep/zero select -- the 1/(1-p) scale is folded into w3.
    tb = h.shape[0]
    row_off = (pl.program_id(0) * tb).astype(jnp.uint32)
    keep = _keep_mask(h.shape, row_off, seed_ref[0].astype(jnp.uint32))
    h = jnp.where(keep, h, 0)

    # fc3 + relu   (w3 already carries the dropout keep-scale)
    h = jnp.dot(h.astype(jnp.bfloat16), w3_ref[...],
                preferred_element_type=jnp.float32).astype(ew)
    h = jnp.maximum(h + b3_ref[...].astype(ew), 0)

    # fc_e (no activation) -> lane-dense f32 store.
    o_ref[...] = jnp.dot(h.astype(jnp.bfloat16), we_ref[...],
                         preferred_element_type=jnp.float32) + be_ref[...]


def _pick_batch_tile(B, block_b):
    if B <= 512:
        # Small batch: one tile covering everything (8-row sublane granularity).
        return _round_up(max(B, 1), 8)
    # Mid/large batch: MXU-friendly multiples of 256, capped at block_b, and at
    # most ~half the batch so the grid has >=2 steps (v7x: both TensorCores busy).
    half = _round_up((B + 1) // 2, 256)
    return max(256, min(block_b, half))


@functools.partial(jax.jit, static_argnames=("out_size", "block_b", "bf16_ew"))
def net_forward(x, params, seed, *, out_size, block_b=1024, bf16_ew=False):
    """x: [B, input_size] f32.  params: bf16 weights (output dims zero-padded to 128,
    w3 pre-scaled by 1/(1-p)), f32 biases [1, out_p]."""
    B, in_dim = x.shape
    unit_p = params["ws"].shape[1]
    out_pad = params["we"].shape[1]

    tb = _pick_batch_tile(B, block_b)
    b_pad = _round_up(B, tb)
    # Pad only batch rows (jnp.pad, fusable).  The feature dim stays at in_dim so
    # the x HBM read is not inflated by a 32->128 column pad; padded batch rows
    # are sliced off below and padded weight/bias columns are exact zeros.
    x_p = x if b_pad == B else jnp.pad(x, ((0, b_pad - B), (0, 0)))

    def w_spec(shape):
        # Constant index_map -> weight/bias tiles stay VMEM-resident across the grid.
        return pl.BlockSpec(shape, lambda i, seed_ref: (0, 0))

    grid_spec = pltpu.PrefetchScalarGridSpec(
        num_scalar_prefetch=1,
        grid=(b_pad // tb,),
        in_specs=[
            pl.BlockSpec((tb, in_dim), lambda i, seed_ref: (i, 0)),   # x (batch-tiled)
            w_spec((in_dim, unit_p)),  w_spec((1, unit_p)),           # fc_s
            w_spec((unit_p, unit_p)),  w_spec((1, unit_p)),           # fc2
            w_spec((unit_p, unit_p)),  w_spec((1, unit_p)),           # fc3 (pre-scaled)
            w_spec((unit_p, out_pad)), w_spec((1, out_pad)),          # fc_e
        ],
        out_specs=pl.BlockSpec((tb, out_pad), lambda i, seed_ref: (i, 0)),
    )

    out_full = pl.pallas_call(
        functools.partial(mlp_kernel, bf16_ew=bf16_ew),
        out_shape=jax.ShapeDtypeStruct((b_pad, out_pad), jnp.float32),
        grid_spec=grid_spec,
        compiler_params=pltpu.CompilerParams(
            # Batch axis is embarrassingly parallel -> shards across v7x's 2 TCs.
            dimension_semantics=("parallel",),
            # NOTE: if unit_size is scaled into the thousands, set vmem_limit_bytes
            # here and tile the hidden (K) dim with an accumulator (v7x: 64 MiB VMEM).
        ),
    )(seed, x_p,
      params["ws"], params["bs"],
      params["w2"], params["b2"],
      params["w3"], params["b3"],
      params["we"], params["be"])

    return out_full[:B, :out_size]


def init_linear(key, in_features, out_features):
    """PyTorch nn.Linear default init: U(-1/sqrt(in), 1/sqrt(in)); weight stored [in, out]."""
    kw, kb = jax.random.split(key)
    bound = 1.0 / float(in_features) ** 0.5
    w = jax.random.uniform(kw, (in_features, out_features), jnp.float32, -bound, bound)
    b = jax.random.uniform(kb, (out_features,), jnp.float32, -bound, bound)
    return w, b


def pad_linear(w, b, in_rows, out_cols, scale=1.0):
    """Zero-pad to the requested dims, optionally fold a scalar scale into the weight
    (used to absorb dropout's 1/(1-p)), and cast the weight to bf16 once for the MXU."""
    in_f, out_f = w.shape
    w_pad = jnp.zeros((in_rows, out_cols), jnp.float32).at[:in_f, :out_f].set(w * scale)
    b_pad = jnp.zeros((1, out_cols), jnp.float32).at[0, :out_f].set(b)
    return w_pad.astype(jnp.bfloat16), b_pad


if __name__ == "__main__":
    input_size, unit_size, output_size = 32, 64, 16
    batch = 8   # NOTE: at these toy sizes the call is launch-overhead bound; the
                # tiling choices above only pay off at batch sizes in the thousands.

    unit_p = _round_up(unit_size, LANE)
    out_p = _round_up(output_size, LANE)

    root = jax.random.PRNGKey(0)
    kx, ks, k2, k3, ke = jax.random.split(root, 5)

    ws, bs = init_linear(ks, input_size, unit_size)
    w2, b2 = init_linear(k2, unit_size, unit_size)
    w3, b3 = init_linear(k3, unit_size, unit_size)
    we, be = init_linear(ke, unit_size, output_size)

    ws_p, bs_p = pad_linear(ws, bs, input_size, unit_p)   # K stays at input_size (no pad)
    w2_p, b2_p = pad_linear(w2, b2, unit_p, unit_p)
    w3_p, b3_p = pad_linear(w3, b3, unit_p, unit_p, scale=1.0 / (1.0 - DROP_P))
    we_p, be_p = pad_linear(we, be, unit_p, out_p)
    params = dict(ws=ws_p, bs=bs_p, w2=w2_p, b2=b2_p, w3=w3_p, b3=b3_p, we=we_p, be=be_p)

    x = jax.random.normal(kx, (batch, input_size), jnp.float32)
    seed = jnp.array([1234], dtype=jnp.int32)

    out = net_forward(x, params, seed, out_size=output_size, bf16_ew=_has_bf16_vpu())
    jax.block_until_ready(out)

    assert out.shape == (batch, output_size), out.shape
    assert out.dtype == jnp.float32
    assert bool(jnp.all(jnp.isfinite(out)))
    print("KERNEL_OK")
</pallas_src>

<mosaic_0001>
module attributes {stable_mosaic.version = 11 : i64} {
  func.func @mlp_kernel(%arg0: i32, %arg1: memref<1xi32, #tpu.memory_space<smem>>, %arg2: memref<8x32xf32, #tpu.memory_space<vmem>>, %arg3: memref<32x128xbf16, #tpu.memory_space<vmem>>, %arg4: memref<1x128xf32, #tpu.memory_space<vmem>>, %arg5: memref<128x128xbf16, #tpu.memory_space<vmem>>, %arg6: memref<1x128xf32, #tpu.memory_space<vmem>>, %arg7: memref<128x128xbf16, #tpu.memory_space<vmem>>, %arg8: memref<1x128xf32, #tpu.memory_space<vmem>>, %arg9: memref<128x128xbf16, #tpu.memory_space<vmem>>, %arg10: memref<1x128xf32, #tpu.memory_space<vmem>>, %arg11: memref<8x128xf32, #tpu.memory_space<vmem>>) attributes {dimension_semantics = [#tpu.dimension_semantics<parallel>], iteration_bounds = array<i64: 1>, scalar_prefetch = 1 : i64, scratch_operands = 0 : i64, tpu.core_type = #tpu.core_type<tc>, window_params = [{transform_indices = @transform_0, window_bounds = array<i64: 8, 32>}, {pipeline_mode = #tpu.pipeline_mode<synchronous>, transform_indices = @transform_1, window_bounds = array<i64: 32, 128>}, {pipeline_mode = #tpu.pipeline_mode<synchronous>, transform_indices = @transform_2, window_bounds = array<i64: 1, 128>}, {pipeline_mode = #tpu.pipeline_mode<synchronous>, transform_indices = @transform_3, window_bounds = array<i64: 128, 128>}, {pipeline_mode = #tpu.pipeline_mode<synchronous>, transform_indices = @transform_4, window_bounds = array<i64: 1, 128>}, {pipeline_mode = #tpu.pipeline_mode<synchronous>, transform_indices = @transform_5, window_bounds = array<i64: 128, 128>}, {pipeline_mode = #tpu.pipeline_mode<synchronous>, transform_indices = @transform_6, window_bounds = array<i64: 1, 128>}, {pipeline_mode = #tpu.pipeline_mode<synchronous>, transform_indices = @transform_7, window_bounds = array<i64: 128, 128>}, {pipeline_mode = #tpu.pipeline_mode<synchronous>, transform_indices = @transform_8, window_bounds = array<i64: 1, 128>}, {transform_indices = @transform_9, window_bounds = array<i64: 8, 128>}]} {
    %c0 = arith.constant 0 : index
    %c0_0 = arith.constant 0 : index
    %0 = vector.load %arg2[%c0, %c0_0] : memref<8x32xf32, #tpu.memory_space<vmem>>, vector<8x32xf32>
    %1 = arith.truncf %0 : vector<8x32xf32> to vector<8x32xbf16>
    %c0_1 = arith.constant 0 : index
    %c0_2 = arith.constant 0 : index
    %2 = vector.load %arg3[%c0_1, %c0_2] : memref<32x128xbf16, #tpu.memory_space<vmem>>, vector<32x128xbf16>
    %cst = arith.constant dense<0.000000e+00> : vector<8x128xf32>
    %3 = tpu.matmul %1, %2, %cst {dimension_numbers = #tpu.dot_dimension_numbers<[1], [0], [0], [1], [0, 0, 1, 1], [], []>} : vector<8x32xbf16>, vector<32x128xbf16>, vector<8x128xf32> -> vector<8x128xf32>
    %c0_3 = arith.constant 0 : index
    %c0_4 = arith.constant 0 : index
    %4 = vector.load %arg4[%c0_3, %c0_4] : memref<1x128xf32, #tpu.memory_space<vmem>>, vector<1x128xf32>
    %5 = vector.broadcast %4 : vector<1x128xf32> to vector<8x128xf32>
    %6 = arith.addf %3, %5 : vector<8x128xf32>
    %cst_5 = arith.constant 0.000000e+00 : f32
    %7 = vector.broadcast %cst_5 : f32 to vector<8x128xf32>
    %8 = arith.maximumf %6, %7 : vector<8x128xf32>
    %9 = arith.truncf %8 : vector<8x128xf32> to vector<8x128xbf16>
    %c0_6 = arith.constant 0 : index
    %c0_7 = arith.constant 0 : index
    %10 = vector.load %arg5[%c0_6, %c0_7] : memref<128x128xbf16, #tpu.memory_space<vmem>>, vector<128x128xbf16>
    %cst_8 = arith.constant dense<0.000000e+00> : vector<8x128xf32>
    %11 = tpu.matmul %9, %10, %cst_8 {dimension_numbers = #tpu.dot_dimension_numbers<[1], [0], [0], [1], [0, 0, 1, 1], [], []>} : vector<8x128xbf16>, vector<128x128xbf16>, vector<8x128xf32> -> vector<8x128xf32>
    %c0_9 = arith.constant 0 : index
    %c0_10 = arith.constant 0 : index
    %12 = vector.load %arg6[%c0_9, %c0_10] : memref<1x128xf32, #tpu.memory_space<vmem>>, vector<1x128xf32>
    %13 = vector.broadcast %12 : vector<1x128xf32> to vector<8x128xf32>
    %14 = arith.addf %11, %13 : vector<8x128xf32>
    %cst_11 = arith.constant 0.000000e+00 : f32
    %15 = vector.broadcast %cst_11 : f32 to vector<8x128xf32>
    %16 = arith.maximumf %14, %15 : vector<8x128xf32>
    %c8_i32 = arith.constant 8 : i32
    %17 = arith.muli %arg0, %c8_i32 : i32
    %c0_12 = arith.constant 0 : index
    %18 = memref.load %arg1[%c0_12] : memref<1xi32, #tpu.memory_space<smem>>
    %19 = tpu.iota {dimensions = array<i32: 0>} : vector<8x128xi32>
    %20 = tpu.iota {dimensions = array<i32: 1>} : vector<8x128xi32>
    %21 = vector.broadcast %17 : i32 to vector<8x128xi32>
    %22 = arith.addi %19, %21 : vector<8x128xi32>
    %c128_i32 = arith.constant 128 : i32
    %23 = vector.broadcast %c128_i32 : i32 to vector<8x128xi32>
    %24 = arith.muli %22, %23 : vector<8x128xi32>
    %25 = arith.addi %24, %20 : vector<8x128xi32>
    %c-1640531527_i32 = arith.constant -1640531527 : i32
    %26 = arith.muli %18, %c-1640531527_i32 : i32
    %27 = vector.broadcast %26 : i32 to vector<8x128xi32>
    %28 = arith.xori %25, %27 : vector<8x128xi32>
    %c16_i32 = arith.constant 16 : i32
    %29 = vector.broadcast %c16_i32 : i32 to vector<8x128xi32>
    %30 = arith.shrui %28, %29 : vector<8x128xi32>
    %31 = arith.xori %28, %30 : vector<8x128xi32>
    %c2146121005_i32 = arith.constant 2146121005 : i32
    %32 = vector.broadcast %c2146121005_i32 : i32 to vector<8x128xi32>
    %33 = arith.muli %31, %32 : vector<8x128xi32>
    %c15_i32 = arith.constant 15 : i32
    %34 = vector.broadcast %c15_i32 : i32 to vector<8x128xi32>
    %35 = arith.shrui %33, %34 : vector<8x128xi32>
    %36 = arith.xori %33, %35 : vector<8x128xi32>
    %c-2073254261_i32 = arith.constant -2073254261 : i32
    %37 = vector.broadcast %c-2073254261_i32 : i32 to vector<8x128xi32>
    %38 = arith.muli %36, %37 : vector<8x128xi32>
    %c16_i32_13 = arith.constant 16 : i32
    %39 = vector.broadcast %c16_i32_13 : i32 to vector<8x128xi32>
    %40 = arith.shrui %38, %39 : vector<8x128xi32>
    %41 = arith.xori %38, %40 : vector<8x128xi32>
    %c8_i32_14 = arith.constant 8 : i32
    %42 = vector.broadcast %c8_i32_14 : i32 to vector<8x128xi32>
    %43 = arith.shrui %41, %42 : vector<8x128xi32>
    %c3355443_i32 = arith.constant 3355443 : i32
    %44 = vector.broadcast %c3355443_i32 : i32 to vector<8x128xi32>
    %45 = arith.cmpi sge, %43, %44 : vector<8x128xi32>
    %c0_i32 = arith.constant 0 : i32
    %46 = arith.sitofp %c0_i32 : i32 to f32
    %47 = vector.broadcast %46 : f32 to vector<8x128xf32>
    %48 = arith.select %45, %16, %47 : vector<8x128xi1>, vector<8x128xf32>
    %49 = arith.truncf %48 : vector<8x128xf32> to vector<8x128xbf16>
    %c0_15 = arith.constant 0 : index
    %c0_16 = arith.constant 0 : index
    %50 = vector.load %arg7[%c0_15, %c0_16] : memref<128x128xbf16, #tpu.memory_space<vmem>>, vector<128x128xbf16>
    %cst_17 = arith.constant dense<0.000000e+00> : vector<8x128xf32>
    %51 = tpu.matmul %49, %50, %cst_17 {dimension_numbers = #tpu.dot_dimension_numbers<[1], [0], [0], [1], [0, 0, 1, 1], [], []>} : vector<8x128xbf16>, vector<128x128xbf16>, vector<8x128xf32> -> vector<8x128xf32>
    %c0_18 = arith.constant 0 : index
    %c0_19 = arith.constant 0 : index
    %52 = vector.load %arg8[%c0_18, %c0_19] : memref<1x128xf32, #tpu.memory_space<vmem>>, vector<1x128xf32>
    %53 = vector.broadcast %52 : vector<1x128xf32> to vector<8x128xf32>
    %54 = arith.addf %51, %53 : vector<8x128xf32>
    %cst_20 = arith.constant 0.000000e+00 : f32
    %55 = vector.broadcast %cst_20 : f32 to vector<8x128xf32>
    %56 = arith.maximumf %54, %55 : vector<8x128xf32>
    %57 = arith.truncf %56 : vector<8x128xf32> to vector<8x128xbf16>
    %c0_21 = arith.constant 0 : index
    %c0_22 = arith.constant 0 : index
    %58 = vector.load %arg9[%c0_21, %c0_22] : memref<128x128xbf16, #tpu.memory_space<vmem>>, vector<128x128xbf16>
    %cst_23 = arith.constant dense<0.000000e+00> : vector<8x128xf32>
    %59 = tpu.matmul %57, %58, %cst_23 {dimension_numbers = #tpu.dot_dimension_numbers<[1], [0], [0], [1], [0, 0, 1, 1], [], []>} : vector<8x128xbf16>, vector<128x128xbf16>, vector<8x128xf32> -> vector<8x128xf32>
    %c0_24 = arith.constant 0 : index
    %c0_25 = arith.constant 0 : index
    %60 = vector.load %arg10[%c0_24, %c0_25] : memref<1x128xf32, #tpu.memory_space<vmem>>, vector<1x128xf32>
    %61 = vector.broadcast %60 : vector<1x128xf32> to vector<8x128xf32>
    %62 = arith.addf %59, %61 : vector<8x128xf32>
    %c0_26 = arith.constant 0 : index
    %c0_27 = arith.constant 0 : index
    %63 = vector.load %arg11[%c0_26, %c0_27] : memref<8x128xf32, #tpu.memory_space<vmem>>, vector<8x128xf32>
    tpu.vector_store %arg11[%c0_26, %c0_27], %62 {strides = array<i32>} : memref<8x128xf32, #tpu.memory_space<vmem>>, vector<8x128xf32>,
    return
  }
  func.func @transform_0(%arg0: i32, %arg1: memref<1xi32, #tpu.memory_space<smem>>) -> (i32, i32) {
    %c0_i32 = arith.constant 0 : i32
    %c0_i32_0 = arith.constant 0 : i32
    return %arg0, %c0_i32 : i32, i32
  }
  func.func @transform_1(%arg0: i32, %arg1: memref<1xi32, #tpu.memory_space<smem>>) -> (i32, i32) {
    %c0_i32 = arith.constant 0 : i32
    %c0_i32_0 = arith.constant 0 : i32
    %c0_i32_1 = arith.constant 0 : i32
    return %c0_i32, %c0_i32_0 : i32, i32
  }
  func.func @transform_2(%arg0: i32, %arg1: memref<1xi32, #tpu.memory_space<smem>>) -> (i32, i32) {
    %c0_i32 = arith.constant 0 : i32
    %c0_i32_0 = arith.constant 0 : i32
    %c0_i32_1 = arith.constant 0 : i32
    return %c0_i32, %c0_i32_0 : i32, i32
  }
  func.func @transform_3(%arg0: i32, %arg1: memref<1xi32, #tpu.memory_space<smem>>) -> (i32, i32) {
    %c0_i32 = arith.constant 0 : i32
    %c0_i32_0 = arith.constant 0 : i32
    %c0_i32_1 = arith.constant 0 : i32
    return %c0_i32, %c0_i32_0 : i32, i32
  }
  func.func @transform_4(%arg0: i32, %arg1: memref<1xi32, #tpu.memory_space<smem>>) -> (i32, i32) {
    %c0_i32 = arith.constant 0 : i32
    %c0_i32_0 = arith.constant 0 : i32
    %c0_i32_1 = arith.constant 0 : i32
    return %c0_i32, %c0_i32_0 : i32, i32
  }
  func.func @transform_5(%arg0: i32, %arg1: memref<1xi32, #tpu.memory_space<smem>>) -> (i32, i32) {
    %c0_i32 = arith.constant 0 : i32
    %c0_i32_0 = arith.constant 0 : i32
    %c0_i32_1 = arith.constant 0 : i32
    return %c0_i32, %c0_i32_0 : i32, i32
  }
  func.func @transform_6(%arg0: i32, %arg1: memref<1xi32, #tpu.memory_space<smem>>) -> (i32, i32) {
    %c0_i32 = arith.constant 0 : i32
    %c0_i32_0 = arith.constant 0 : i32
    %c0_i32_1 = arith.constant 0 : i32
    return %c0_i32, %c0_i32_0 : i32, i32
  }
  func.func @transform_7(%arg0: i32, %arg1: memref<1xi32, #tpu.memory_space<smem>>) -> (i32, i32) {
    %c0_i32 = arith.constant 0 : i32
    %c0_i32_0 = arith.constant 0 : i32
    %c0_i32_1 = arith.constant 0 : i32
    return %c0_i32, %c0_i32_0 : i32, i32
  }
  func.func @transform_8(%arg0: i32, %arg1: memref<1xi32, #tpu.memory_space<smem>>) -> (i32, i32) {
    %c0_i32 = arith.constant 0 : i32
    %c0_i32_0 = arith.constant 0 : i32
    %c0_i32_1 = arith.constant 0 : i32
    return %c0_i32, %c0_i32_0 : i32, i32
  }
  func.func @transform_9(%arg0: i32, %arg1: memref<1xi32, #tpu.memory_space<smem>>) -> (i32, i32) {
    %c0_i32 = arith.constant 0 : i32
    %c0_i32_0 = arith.constant 0 : i32
    return %arg0, %c0_i32 : i32, i32
  }
}

</mosaic_0001>

<bundles_post_ra>
// kernel: net_forward.1
= control target key start
LH: loop header
LB: loop body
LE: loop exit
PB: predicated region body
PF: predicated region fallthrough
CT: control target
= control target key end

     0   :  { %16 = vsyncpa [#allocation5], 0  ;;  %s1012_s0 = inlined_call_operand.<no memory space> [shape: s32[1], index: 0, kind: input, shape index: {}]   ;;  %s1013_s1 = inlined_call_operand.hbm [shape: f32[8,32], index: 1, kind: input, shape index: {}]   ;;  %s1014_s2 = inlined_call_operand.vmem [shape: bf16[32,128], index: 2, kind: input, shape index: {}]   ;;  %s1015_s3 = inlined_call_operand.vmem [shape: f32[1,128], index: 3, kind: input, shape index: {}]   ;;  %s1016_s4 = inlined_call_operand.hbm [shape: bf16[128,128], index: 4, kind: input, shape index: {}]   ;;  %s1017_s5 = inlined_call_operand.vmem [shape: f32[1,128], index: 5, kind: input, shape index: {}]   ;;  %s1018_s6 = inlined_call_operand.hbm [shape: bf16[128,128], index: 6, kind: input, shape index: {}]   ;;  %s1019_s7 = inlined_call_operand.vmem [shape: f32[1,128], index: 7, kind: input, shape index: {}]   ;;  %s1020_s8 = inlined_call_operand.hbm [shape: bf16[128,128], index: 8, kind: input, shape index: {}]   ;;  %s1021_s9 = inlined_call_operand.vmem [shape: f32[1,128], index: 9, kind: input, shape index: {}]   ;;  %s1022_s10 = inlined_call_operand.hbm [shape: f32[8,128], index: 10, kind: output, shape index: {}]  }
   0x1   :  { %17 = vsyncpa [#allocation8], 0 }
   0x2   :  { %18 = vsyncpa [#allocation11], 0 }
   0x3   :  { %19 = vsyncpa [#allocation6], 0  ;;  %s824_s13 = smov [#allocation7]   ;;  %s706_s17 = scalar_lea.hbm %s1016_s4, 1024 }
   0x4   :  { %s39_s14 = sshll.u32 %s824_s13, 4  ;;  %p707_p0 = scmp.ne.s32.totalorder %s1016_s4, %s706_s17  ;;  %s40_s14 = int_to_ptr.vmem [resolvable:$true] %s39_s14 }
   0x5   :  { %p710_p1 = scmp.lt.u32.totalorder %s706_s17, %s1016_s4 }
   0x7   :  { %p712_p2 = pnand %p710_p1, %p707_p0 }
   0x9   :  { %715 = shalt.err (!%p712_p2)
}
   0xa   :  { %s716_s22 = scalar_lea.vmem %s40_s14, 1024  ;;  %p721_p4 = scmp.lt.s32.totalorder %s40_s14, %s40_s14 }
   0xb   :  { %p717_p3 = scmp.ne.s32.totalorder %s40_s14, %s716_s22  ;;  %p722_p5 = scmp.lt.s32.totalorder %s716_s22, %s716_s22 }
   0xd   :  { %p723_p6 = por %p722_p5, %p721_p4 }
   0xf   :  { %p724_p7 = pnand %p723_p6, %p717_p3 }
  0x11   :  { %727 = shalt.err (!%p724_p7)
}
  0x12   :  { %s825_s23 = smov 64   ;;  %s826_s24 = smov 4  }
  0x13   :  { %45 = dma.hbm_to_vmem [thread:$0]  %s1016_s4, 1024, %s40_s14, [#allocation8], %s825_s23, %s825_s23, %s826_s24  }
  0x14   :  { %s827_s27 = smov [#allocation4]   ;;  %s828_s29 = smov [#allocation9]  }
  0x15   :  { %s26_s28 = sshll.u32 %s827_s27, 4  ;;  %s53_s30 = sshll.u32 %s828_s29, 4  ;;  %s27_s28 = int_to_ptr.vmem [resolvable:$true] %s26_s28  ;;  %s54_s30 = int_to_ptr.vmem [resolvable:$true] %s53_s30 }
  0x16   :  { %s728_s13 = scalar_lea.hbm %s1013_s1, 128 }
  0x17   :  { %p729_p8 = scmp.ne.s32.totalorder %s1013_s1, %s728_s13  ;;  %p732_p9 = scmp.lt.u32.totalorder %s728_s13, %s1013_s1 }
  0x19   :  { %p734_p10 = pnand %p732_p9, %p729_p8 }
  0x1b   :  { %737 = shalt.err (!%p734_p10)
}
  0x1c   :  { %s738_s4 = scalar_lea.vmem %s27_s28, 128  ;;  %p743_p12 = scmp.lt.s32.totalorder %s27_s28, %s27_s28 }
  0x1d   :  { %p739_p11 = scmp.ne.s32.totalorder %s27_s28, %s738_s4  ;;  %p744_p13 = scmp.lt.s32.totalorder %s738_s4, %s738_s4 }
  0x1f   :  { %p745_p0 = por %p744_p13, %p743_p12 }
  0x21   :  { %p746_p1 = pnand %p745_p0, %p739_p11 }
  0x23   :  { %749 = shalt.err (!%p746_p1)
}
  0x24   :  { %29 = dma.hbm_to_vmem [thread:$0]  %s1013_s1, 128, %s27_s28, [#allocation5]  }
  0x25   :  { %s750_s22 = scalar_lea.hbm %s1018_s6, 1024 }
  0x26   :  { %p751_p2 = scmp.ne.s32.totalorder %s1018_s6, %s750_s22  ;;  %p754_p3 = scmp.lt.u32.totalorder %s750_s22, %s1018_s6 }
  0x28   :  { %p756_p4 = pnand %p754_p3, %p751_p2 }
  0x2a   :  { %759 = shalt.err (!%p756_p4)
}
  0x2b   :  { %s760_s11 = scalar_lea.vmem %s54_s30, 1024  ;;  %p765_p6 = scmp.lt.s32.totalorder %s54_s30, %s54_s30 }
  0x2c   :  { %p761_p5 = scmp.ne.s32.totalorder %s54_s30, %s760_s11  ;;  %p766_p7 = scmp.lt.s32.totalorder %s760_s11, %s760_s11 }
  0x2e   :  { %p767_p8 = por %p766_p7, %p765_p6 }
  0x30   :  { %p768_p9 = pnand %p767_p8, %p761_p5 }
  0x32   :  { %771 = shalt.err (!%p768_p9)
}
  0x33   :  { %59 = dma.hbm_to_vmem [thread:$0]  %s1018_s6, 1024, %s54_s30, [#allocation8], %s825_s23, %s825_s23, %s826_s24  }
  0x34   :  { %s829_s12 = smov [#allocation10]   ;;  %s772_s17 = scalar_lea.hbm %s1020_s8, 1024 }
  0x35   :  { %s67_s13 = sshll.u32 %s829_s12, 4  ;;  %p773_p10 = scmp.ne.s32.totalorder %s1020_s8, %s772_s17  ;;  %s68_s13 = int_to_ptr.vmem [resolvable:$true] %s67_s13 }
  0x36   :  { %p776_p11 = scmp.lt.u32.totalorder %s772_s17, %s1020_s8 }
  0x38   :  { %p778_p12 = pnand %p776_p11, %p773_p10 }
  0x3a   :  { %781 = shalt.err (!%p778_p12)
}
  0x3b   :  { %s782_s20 = scalar_lea.vmem %s68_s13, 1024  ;;  %p787_p0 = scmp.lt.s32.totalorder %s68_s13, %s68_s13 }
  0x3c   :  { %p783_p13 = scmp.ne.s32.totalorder %s68_s13, %s782_s20  ;;  %p788_p1 = scmp.lt.s32.totalorder %s782_s20, %s782_s20 }
  0x3e   :  { %p789_p2 = por %p788_p1, %p787_p0 }
  0x40   :  { %p790_p3 = pnand %p789_p2, %p783_p13 }
  0x42   :  { %793 = shalt.err (!%p790_p3)
}
  0x43   :  { %73 = dma.hbm_to_vmem [thread:$0]  %s1020_s8, 1024, %s68_s13, [#allocation11], %s825_s23, %s825_s23, %s826_s24  }
  0x44   :  { %816 = dma.done.wait [#allocation5], 128  }
  0x45   :  { %817 = vsyncadd [#allocation5], 4294967168 }
  0x46   :  { %818 = dma.done.wait [#allocation8], 2048  }
  0x47   :  { %819 = vsyncadd [#allocation8], 4294965248 }
  0x48   :  { %820 = dma.done.wait [#allocation11], 1024  }
  0x49   :  { %821 = vsyncadd [#allocation11], 4294966272  ;;  %v830_v0 = vmov 0.0   ;;  %vm831_vm0 = vmmov 0   ;;  %v680_v1 = vld [vmem:[%s1014_s2] sm:$0xff]   ;;  %v681_v2 = vld [vmem:[%s1014_s2 + $0x8] sm:$0xff]   ;;  %v274_v35 = vlaneseq }
  0x4a   :  { %603 = vmatprep.subr.bf16.mxu0 %v830_v0  ;;  %607 = vmatprep.mubr.msk.bf16.mxu0 %vm831_vm0, %v830_v0  ;;  %v89_v3 = vld [vmem:[#allocation4] sm:$0xff]  ;;  %v682_v4 = vld [vmem:[#allocation7] sm:$0xff]   ;;  %v683_v6 = vld [vmem:[#allocation7 + $0x8] sm:$0xff]   ;;  %vm114_vm1 = vcmask 261120   ;;  %s282_s26 = smul.u32 2654435769, %s1012_s0 }
  0x4b   :  { %611 = vmatprep.subr.bf16.mxu1 %v830_v0  ;;  %627 = vmatprep.mubr.msk.bf16.mxu1 %vm831_vm0, %v830_v0  ;;  %v90_v5 = vpack.c.bf16 %v89_v3, %v89_v3  ;;  %v684_v7 = vld [vmem:[#allocation7 + $0x10] sm:$0xff]   ;;  %v685_v8 = vld [vmem:[#allocation7 + $0x18] sm:$0xff]   ;;  %v686_v9 = vld [vmem:[#allocation7 + $0x20] sm:$0xff]   ;;  %v275_v36 = vshrl.u32 %v274_v35, 7  ;;  %v277_v37 = vand.u32 127, %v274_v35  ;;  %s832_s28 = smov [#allocation12]  }
  0x4c   :  { %604 = vmatpush3.bf16.msra.mxu0 %v680_v1  ;;  %612 = vmatpush3.bf16.msra.mxu1 %v682_v4  ;;  %v687_v10 = vld [vmem:[#allocation7 + $0x28] sm:$0xff]   ;;  %v688_v11 = vld [vmem:[#allocation7 + $0x30] sm:$0xff]   ;;  %v689_v12 = vld [vmem:[#allocation7 + $0x38] sm:$0xff]   ;;  %v283_v40 = vstv %s282_s26  ;;  %s528_s12 = sshll.u32 %s832_s28, 4  ;;  %s529_s12 = int_to_ptr.vmem [resolvable:$true] %s528_s12 }
  0x4d   :  { %605 = vmatprep.subr.bf16.mxu0 %v830_v0  ;;  %613 = vmatprep.subr.bf16.mxu1 %v830_v0  ;;  %v690_v13 = vld [vmem:[#allocation9] sm:$0xff]   ;;  %v691_v14 = vld [vmem:[#allocation9 + $0x8] sm:$0xff]   ;;  %v692_v15 = vld [vmem:[#allocation9 + $0x10] sm:$0xff]   ;;  %v280_v38 = vmul.u32 128, %v275_v36  ;;  %p799_p5 = scmp.lt.s32.totalorder %s529_s12, %s529_s12 }
  0x4e   :  { %v693_v16 = vld [vmem:[#allocation9 + $0x18] sm:$0xff]   ;;  %v694_v17 = vld [vmem:[#allocation9 + $0x20] sm:$0xff]   ;;  %v695_v18 = vld [vmem:[#allocation9 + $0x28] sm:$0xff]  }
  0x4f   :  { %v539_v19 = vld [vmem:[%s1015_s3] ss:$0 sm:$0xff]  ;;  %v696_v27 = vld [vmem:[#allocation9 + $0x30] sm:$0xff]   ;;  %v698_v29 = vld [vmem:[#allocation10] sm:$0xff]   ;;  %v281_v39 = vadd.s32 %v280_v38, %v277_v37 }
  0x50   :  { %606 = vmatpush3.bf16.msra.mxu0 %v681_v2  ;;  %614 = vmatpush3.bf16.msra.mxu1 %v683_v6  ;;  %v697_v28 = vld [vmem:[#allocation9 + $0x38] sm:$0xff]   ;;  %v699_v30 = vld [vmem:[#allocation10 + $0x8] sm:$0xff]   ;;  %v700_v31 = vld [vmem:[#allocation10 + $0x10] sm:$0xff]  }
  0x51   :  { %631 = vmatprep.subr.bf16.mxu0 %v830_v0  ;;  %615 = vmatprep.subr.bf16.mxu1 %v830_v0  ;;  %v701_v32 = vld [vmem:[#allocation10 + $0x18] sm:$0xff]   ;;  %v702_v33 = vld [vmem:[#allocation10 + $0x20] sm:$0xff]   ;;  %v703_v34 = vld [vmem:[#allocation10 + $0x28] sm:$0xff]   ;;  %v284_v41 = vxor.u32 %v283_v40, %v281_v39 }
  0x52   :  { %v543_v51 = vld [vmem:[%s1017_s5] ss:$0 sm:$0xff]  ;;  %v704_v59 = vld [vmem:[#allocation10 + $0x30] sm:$0xff]  }
  0x53   :  { %608 = vmatmul.mubr.msk.bf16.vlgmr.msra.gmra.mrb[0].mxu0 %vm114_vm1, %v90_v5  ;;  %v285_v42 = vshrl.u32 %v284_v41, 16  ;;  %v705_v60 = vld [vmem:[#allocation10 + $0x38] sm:$0xff]  }
  0x54   :  { %647 = vmatprep.mubr.msk.bf16.mxu0 %vm831_vm0, %v830_v0  ;;  %616 = vmatpush3.bf16.msra.mxu1 %v684_v7  ;;  %v552_v61 = vld [vmem:[%s1019_s7] ss:$0 sm:$0xff]  ;;  %s794_s7 = scalar_lea.vmem %s529_s12, 128 }
  0x55   :  { %617 = vmatprep.subr.bf16.mxu1 %v830_v0  ;;  %632 = vmatpush3.bf16.msra.mxu0 %v690_v13  ;;  %v286_v43 = vxor.u32 %v285_v42, %v284_v41  ;;  %v564_v6 = vld [vmem:[%s1021_s9] ss:$0 sm:$0xff]  ;;  %p795_p4 = scmp.ne.s32.totalorder %s529_s12, %s794_s7  ;;  %p800_p6 = scmp.lt.s32.totalorder %s794_s7, %s794_s7 }
  0x56   :  { %633 = vmatprep.subr.bf16.mxu0 %v830_v0 }
  0x57   :  { %v287_v44 = vmul.u32 2146121005, %v286_v43  ;;  %p801_p7 = por %p800_p6, %p799_p5 }
  0x58   :  { %618 = vmatpush3.bf16.msra.mxu1 %v685_v8 }
  0x59   :  { %619 = vmatprep.subr.bf16.mxu1 %v830_v0  ;;  %634 = vmatpush3.bf16.msra.mxu0 %v691_v14  ;;  %v288_v45 = vshrl.u32 %v287_v44, 15  ;;  %p802_p8 = pnand %p801_p7, %p795_p4 }
  0x5a   :  { %635 = vmatprep.subr.bf16.mxu0 %v830_v0 }
  0x5b   :  { %v289_v46 = vxor.u32 %v288_v45, %v287_v44 }
  0x5c   :  { %620 = vmatpush3.bf16.msra.mxu1 %v686_v9 }
  0x5d   :  { %621 = vmatprep.subr.bf16.mxu1 %v830_v0  ;;  %636 = vmatpush3.bf16.msra.mxu0 %v692_v15  ;;  %v290_v47 = vmul.u32 2221713035, %v289_v46 }
  0x5e   :  { %637 = vmatprep.subr.bf16.mxu0 %v830_v0 }
  0x5f   :  { %v291_v48 = vshrl.u32 %v290_v47, 16 }
  0x60   :  { %622 = vmatpush3.bf16.msra.mxu1 %v687_v10 }
  0x61   :  { %623 = vmatprep.subr.bf16.mxu1 %v830_v0  ;;  %638 = vmatpush3.bf16.msra.mxu0 %v693_v16  ;;  %v292_v49 = vxor.u32 %v291_v48, %v290_v47 }
  0x62   :  { %639 = vmatprep.subr.bf16.mxu0 %v830_v0 }
  0x63   :  { %v293_v50 = vshrl.u32 %v292_v49, 8 }
  0x64   :  { %624 = vmatpush3.bf16.msra.mxu1 %v688_v11 }
  0x65   :  { %625 = vmatprep.subr.bf16.mxu1 %v830_v0  ;;  %640 = vmatpush3.bf16.msra.mxu0 %v694_v17  ;;  %vm294_vm2 = vcmp.ge.s32.totalorder %v293_v50, 3355443 }
  0x66   :  { %641 = vmatprep.subr.bf16.mxu0 %v830_v0  ;;  %vm561_vm3 = vmpackc.low %vm294_vm2, %vm294_vm2 }
  0x68   :  { %626 = vmatpush3.bf16.msra.mxu1 %v689_v12 }
  0x69   :  { %651 = vmatprep.subr.bf16.mxu1 %v830_v0  ;;  %642 = vmatpush3.bf16.msra.mxu0 %v695_v18 }
  0x6a   :  { %643 = vmatprep.subr.bf16.mxu0 %v830_v0 }
  0x6d   :  { %644 = vmatpush3.bf16.msra.mxu0 %v696_v27 }
  0x6e   :  { %645 = vmatprep.subr.bf16.mxu0 %v830_v0 }
  0x71   :  { %646 = vmatpush3.bf16.msra.mxu0 %v697_v28 }
 0x126   :  { %v152_v20 = vpop.f32.mrb[0].mxu0 }
 0x127   :  { %v153_v21 = vadd.f32 %v539_v19, %v152_v20  ;;  %v609_v22 = vpop.f32.mrb[1].mxu0 }
 0x128   :  { %v155_v23 = vpop.f32.mrb[2].mxu0 }
 0x129   :  { %v158_v24 = vmax.f32 %v153_v21, 0.0  ;;  %v610_v25 = vpop.f32.mrb[3].mxu0 }
 0x12b   :  { %v159_v26 = vpack.c.bf16 %v158_v24, %v158_v24 }
 0x12d   :  { %628 = vmatmul.mubr.bf16.vlgmr.msra.gmra.mrb[0].mxu1 %v159_v26 }
 0x12e   :  { %667 = vmatprep.mubr.msk.bf16.mxu1 %vm831_vm0, %v830_v0  ;;  %652 = vmatpush3.bf16.msra.mxu1 %v698_v29 }
 0x12f   :  { %653 = vmatprep.subr.bf16.mxu1 %v830_v0 }
 0x132   :  { %654 = vmatpush3.bf16.msra.mxu1 %v699_v30 }
 0x133   :  { %655 = vmatprep.subr.bf16.mxu1 %v830_v0 }
 0x136   :  { %656 = vmatpush3.bf16.msra.mxu1 %v700_v31 }
 0x137   :  { %657 = vmatprep.subr.bf16.mxu1 %v830_v0 }
 0x13a   :  { %658 = vmatpush3.bf16.msra.mxu1 %v701_v32 }
 0x13b   :  { %659 = vmatprep.subr.bf16.mxu1 %v830_v0 }
 0x13e   :  { %660 = vmatpush3.bf16.msra.mxu1 %v702_v33 }
 0x13f   :  { %661 = vmatprep.subr.bf16.mxu1 %v830_v0 }
 0x142   :  { %662 = vmatpush3.bf16.msra.mxu1 %v703_v34 }
 0x143   :  { %663 = vmatprep.subr.bf16.mxu1 %v830_v0 }
 0x146   :  { %664 = vmatpush3.bf16.msra.mxu1 %v704_v59 }
 0x147   :  { %665 = vmatprep.subr.bf16.mxu1 %v830_v0 }
 0x14a   :  { %666 = vmatpush3.bf16.msra.mxu1 %v705_v60 }
 0x200   :  { %v265_v52 = vpop.f32.mrb[0].mxu1 }
 0x201   :  { %v266_v53 = vadd.f32 %v543_v51, %v265_v52  ;;  %v629_v54 = vpop.f32.mrb[1].mxu1 }
 0x202   :  { %v268_v55 = vpop.f32.mrb[2].mxu1 }
 0x203   :  { %v271_v56 = vmax.f32 %v266_v53, 0.0  ;;  %v630_v57 = vpop.f32.mrb[3].mxu1 }
 0x205   :  { %v562_v58 = vpack.c.bf16 %v271_v56, %v271_v56 }
 0x207   :  { %648 = vmatmul.mubr.msk.bf16.vlgmr.msra.gmra.mrb[4].mxu0 %vm561_vm3, %v562_v58 }
 0x2da   :  { %v402_v62 = vpop.f32.mrb[4].mxu0 }
 0x2db   :  { %v403_v63 = vadd.f32 %v552_v61, %v402_v62  ;;  %v649_v1 = vpop.f32.mrb[5].mxu0 }
 0x2dc   :  { %v405_v2 = vpop.f32.mrb[6].mxu0 }
 0x2dd   :  { %v408_v3 = vmax.f32 %v403_v63, 0.0  ;;  %v650_v4 = vpop.f32.mrb[7].mxu0 }
 0x2df   :  { %v409_v5 = vpack.c.bf16 %v408_v3, %v408_v3 }
 0x2e1   :  { %668 = vmatmul.mubr.bf16.vlgmr.msra.gmra.mrb[4].mxu1 %v409_v5 }
 0x3b4   :  { %v515_v0 = vpop.f32.mrb[4].mxu1 }
 0x3b5   :  { %v516_v7 = vadd.f32 %v564_v6, %v515_v0  ;;  %v669_v8 = vpop.f32.mrb[5].mxu1 }
 0x3b6   :  { %v518_v9 = vpop.f32.mrb[6].mxu1 }
 0x3b7   :  { %521 = vst [vmem:[#allocation12] sm:$0xff] %v516_v7  ;;  %v670_v10 = vpop.f32.mrb[7].mxu1 }
 0x3b8   :  { %805 = shalt.err (!%p802_p8)
}
 0x3b9   :  { %s806_s9 = scalar_lea.hbm %s1022_s10, 128 }
 0x3ba   :  { %p807_p9 = scmp.ne.s32.totalorder %s1022_s10, %s806_s9  ;;  %p810_p10 = scmp.lt.u32.totalorder %s806_s9, %s1022_s10 }
 0x3bc   :  { %p812_p11 = pnand %p810_p10, %p807_p9 }
 0x3be   :  { %815 = shalt.err (!%p812_p11)
}
 0x3bf   :  { %531 = dma.vmem_to_hbm [thread:$0]  %s529_s12, 128, %s1022_s10, [#allocation6]  }
 0x3c0   :  { %822 = dma.done.wait [#allocation6], 128  }
 0x3c1   :  { %823 = vsyncadd [#allocation6], 4294967168 }
 0x3c2   :  { %535 = vsyncpa [#allocation5], 1 }
 0x3c3   :  { %536 = vsyncpa [#allocation8], 1 }
 0x3c4   :  { %537 = vsyncpa [#allocation11], 1 }
 0x3c5   :  { %538 = vsyncpa [#allocation6], 1 }

</bundles_post_ra>
